<compile_context>
chip_gen: v5e
topology: v5e:2x2
jax: 0.10.0
libtpu: 0.0.40
codegen_flags: <defaults>
</compile_context>

<pallas_src>
import jax
import jax.numpy as jnp
from jax.experimental import pallas as pl
from jax.experimental.pallas import tpu as pltpu

FEAT_DIM = 2048   # fixed by the module: Linear(2048, output_dim)
C_CHUNK = 512     # channel reduction chunk -> 4 pipelined steps over C=2048


def _round_up(x, m):
    return -(-x // m) * m


def _vmem_budget_bytes():
    """~75% of physical VMEM: ≈48 MiB on v7x (64 MiB), ≈96 MiB on v5e/v6e (128 MiB)."""
    phys = 64 << 20  # conservative fallback (smallest physical VMEM of supported chips)
    try:
        info = pltpu.get_tpu_info()
        phys = int(getattr(info, "vmem_capacity_bytes", phys)) or phys
    except Exception:
        pass
    return (phys * 3) // 4


def _pick_batch_tile(B, HW, Dp, feat_itemsize, w_itemsize, budget):
    """Largest batch tile (divisor of B) whose estimated VMEM footprint fits `budget`."""
    hw_pad = _round_up(max(HW, 1), 8)
    fixed = 2 * FEAT_DIM * Dp * w_itemsize      # resident weight (double-buffered)
    fixed += 2 * 8 * Dp * 4                     # resident bias

    def usage(tb):
        tb_pad = _round_up(tb, 8)
        u = fixed
        u += 2 * tb * hw_pad * C_CHUNK * feat_itemsize   # feature chunk (double-buffered)
        u += 2 * tb_pad * Dp * feat_itemsize             # output tile (double-buffered)
        u += tb_pad * Dp * 4                             # f32 accumulator scratch
        return u

    for cand in (64, 32, 16, 8, 4, 2, 1):
        if cand <= B and B % cand == 0 and usage(cand) <= budget:
            return cand
    return 1


def _pool_project_kernel(f_ref, w_ref, b_ref, o_ref, acc_ref):
    """One (batch-tile, channel-chunk) step of fused pool + flatten + Linear.

    f_ref  : (TB, HW, C_CHUNK)  channel-minor feature chunk
    w_ref  : (2048, Dp)         resident weight = W^T / HW  (pooling scale folded in)
    b_ref  : (1, Dp)            resident bias
    o_ref  : (TB, Dp)           output tile (written on the last chunk only)
    acc_ref: (TB, Dp) f32       VMEM accumulator across channel chunks
    """
    k = pl.program_id(1)

    @pl.when(k == 0)
    def _():
        acc_ref[...] = jnp.zeros_like(acc_ref)

    # Spatial sum over HW (sublane axis); accumulate in f32 even for bf16 features.
    pooled = jnp.sum(f_ref[...], axis=1, dtype=jnp.float32)          # (TB, C_CHUNK)

    # Slice the resident weight for this channel chunk (aligned dynamic sublane slice).
    off = pl.multiple_of(k * C_CHUNK, C_CHUNK)
    w_chunk = w_ref[pl.ds(off, C_CHUNK), :]                          # (C_CHUNK, Dp)

    acc_ref[...] += jnp.dot(pooled, w_chunk, preferred_element_type=jnp.float32)

    @pl.when(k == pl.num_programs(1) - 1)
    def _():
        o_ref[...] = (acc_ref[...] + b_ref[...]).astype(o_ref.dtype)


def resnet_feature_extractor_head(feat_nchw, proj_weight, proj_bias):
    """feat_nchw: (B, 2048, H, W) conv-trunk output (PyTorch NCHW layout).
    proj_weight: (output_dim, 2048)  PyTorch Linear weight layout.
    proj_bias:   (output_dim,)
    returns:     (B, output_dim)
    """
    B, C, H, W = feat_nchw.shape
    assert C == FEAT_DIM, "projection expects 2048 input features"
    assert C % C_CHUNK == 0
    D = proj_weight.shape[0]
    HW = H * W
    feat_itemsize = jnp.dtype(feat_nchw.dtype).itemsize
    w_itemsize = jnp.dtype(proj_weight.dtype).itemsize

    # Channel-minor view for the kernel: C dense on lanes, HW on sublanes.
    # (A trunk already producing NHWC — the native TPU conv layout — skips this transpose.)
    f = jnp.transpose(feat_nchw, (0, 2, 3, 1)).reshape(B, HW, C)

    # One-time host weight prep: transpose to (2048, D), fold in the 1/HW pooling scale,
    # and lane-pad D to a multiple of 128 so output stores are dense; slice off after.
    Dp = _round_up(max(D, 128), 128)
    w = (proj_weight.T * (1.0 / HW)).astype(proj_weight.dtype)
    bvec = proj_bias
    if Dp != D:
        w = jnp.pad(w, ((0, 0), (0, Dp - D)))
        bvec = jnp.pad(bvec, (0, Dp - D))
    b2 = bvec.reshape(1, Dp)

    budget = _vmem_budget_bytes()
    TB = _pick_batch_tile(B, HW, Dp, feat_itemsize, w_itemsize, budget)
    grid = (B // TB, C // C_CHUNK)

    cost = pl.CostEstimate(
        flops=2 * B * C * Dp + B * C * HW,      # projection matmul + pooling adds
        transcendentals=0,
        bytes_accessed=(B * C * HW * feat_itemsize
                        + C * Dp * w_itemsize
                        + Dp * jnp.dtype(b2.dtype).itemsize
                        + B * Dp * feat_itemsize))

    out = pl.pallas_call(
        _pool_project_kernel,
        out_shape=jax.ShapeDtypeStruct((B, Dp), feat_nchw.dtype),
        grid_spec=pltpu.PrefetchScalarGridSpec(
            num_scalar_prefetch=0,
            grid=grid,
            in_specs=[
                # channel-minor feature chunk: batch-tiled, chunked over C
                pl.BlockSpec((TB, HW, C_CHUNK), lambda i, k: (i, 0, k)),
                # resident weight (constant index -> fetched once, sliced in-kernel)
                pl.BlockSpec((C, Dp), lambda i, k: (0, 0)),
                # resident bias
                pl.BlockSpec((1, Dp), lambda i, k: (0, 0)),
            ],
            out_specs=pl.BlockSpec((TB, Dp), lambda i, k: (i, 0)),
            scratch_shapes=[pltpu.VMEM((TB, Dp), jnp.float32)],
        ),
        compiler_params=pltpu.CompilerParams(
            dimension_semantics=("parallel", "arbitrary"),
            vmem_limit_bytes=int(budget)),
        cost_estimate=cost,
    )(f, w, b2)

    return out[:, :D] if Dp != D else out


def _reference(feat_nchw, proj_weight, proj_bias):
    # Pure-JAX reference mirroring the PyTorch forward.
    pooled = jnp.mean(feat_nchw, axis=(2, 3))              # AdaptiveAvgPool2d(1) + flatten
    return pooled @ proj_weight.T + proj_bias              # Linear(2048, D)


if __name__ == "__main__":
    B, C, H, W = 2, FEAT_DIM, 4, 4      # small trunk-output spatial size
    OUTPUT_DIM = 128

    key = jax.random.PRNGKey(0)
    k_x, k_w, k_b = jax.random.split(key, 3)

    # Deterministic synthetic inputs / parameters (no checkpoint loading).
    x_feat = jax.random.normal(k_x, (B, C, H, W), dtype=jnp.float32)
    bound = 1.0 / (C ** 0.5)            # matches nn.Linear default init scale
    proj_w = jax.random.uniform(k_w, (OUTPUT_DIM, C), minval=-bound, maxval=bound,
                                dtype=jnp.float32)
    proj_b = jax.random.uniform(k_b, (OUTPUT_DIM,), minval=-bound, maxval=bound,
                                dtype=jnp.float32)

    out = jax.block_until_ready(resnet_feature_extractor_head(x_feat, proj_w, proj_b))

    ref = _reference(x_feat, proj_w, proj_b)
    assert out.shape == (B, OUTPUT_DIM)
    assert jnp.allclose(out, ref, atol=1e-4, rtol=1e-4), "mismatch vs reference"

    print("KERNEL_OK")
</pallas_src>

<mosaic_0001>
module attributes {stable_mosaic.version = 11 : i64} {
  func.func @_pool_project_kernel(%arg0: i32, %arg1: i32, %arg2: memref<2x16x512xf32, #tpu.memory_space<vmem>>, %arg3: memref<2048x128xf32, #tpu.memory_space<vmem>>, %arg4: memref<1x128xf32, #tpu.memory_space<vmem>>, %arg5: memref<2x128xf32, #tpu.memory_space<vmem>>, %arg6: memref<2x128xf32, #tpu.memory_space<vmem>>) attributes {dimension_semantics = [#tpu.dimension_semantics<parallel>, #tpu.dimension_semantics<arbitrary>], iteration_bounds = array<i64: 1, 4>, scalar_prefetch = 0 : i64, scratch_operands = 1 : i64, tpu.core_type = #tpu.core_type<tc>, window_params = [{transform_indices = @transform_0, window_bounds = array<i64: 2, 16, 512>}, {pipeline_mode = #tpu.pipeline_mode<synchronous>, transform_indices = @transform_1, window_bounds = array<i64: 2048, 128>}, {pipeline_mode = #tpu.pipeline_mode<synchronous>, transform_indices = @transform_2, window_bounds = array<i64: 1, 128>}, {transform_indices = @transform_3, window_bounds = array<i64: 2, 128>}]} {
    %c0_i32 = arith.constant 0 : i32
    %0 = arith.cmpi eq, %arg1, %c0_i32 : i32
    %1 = arith.extui %0 : i1 to i32
    %c0_i32_0 = arith.constant 0 : i32
    %2 = arith.cmpi ne, %1, %c0_i32_0 : i32
    scf.if %2 {
      %cst_10 = arith.constant 0.000000e+00 : f32
      %16 = vector.broadcast %cst_10 : f32 to vector<2x128xf32>
      %c0_11 = arith.constant 0 : index
      %c0_12 = arith.constant 0 : index
      %17 = vector.load %arg6[%c0_11, %c0_12] : memref<2x128xf32, #tpu.memory_space<vmem>>, vector<2x128xf32>
      tpu.vector_store %arg6[%c0_11, %c0_12], %16 {strides = array<i32>} : memref<2x128xf32, #tpu.memory_space<vmem>>, vector<2x128xf32>,
    } else {
    }
    %c0 = arith.constant 0 : index
    %c0_1 = arith.constant 0 : index
    %c0_2 = arith.constant 0 : index
    %3 = vector.load %arg2[%c0, %c0_1, %c0_2] : memref<2x16x512xf32, #tpu.memory_space<vmem>>, vector<2x16x512xf32>
    %cst = arith.constant dense<0.000000e+00> : vector<2x512xf32>
    %4 = vector.multi_reduction <add>, %3, %cst [1] : vector<2x16x512xf32> to vector<2x512xf32>
    %c512_i32 = arith.constant 512 : i32
    %5 = arith.muli %arg1, %c512_i32 : i32
    %6 = tpu.assume_multiple %5, 512 : i32
    %7 = arith.index_cast %6 : i32 to index
    %c0_3 = arith.constant 0 : index
    %8 = vector.load %arg3[%7, %c0_3] : memref<2048x128xf32, #tpu.memory_space<vmem>>, vector<512x128xf32>
    %c0_4 = arith.constant 0 : index
    %c0_5 = arith.constant 0 : index
    %9 = vector.load %arg6[%c0_4, %c0_5] : memref<2x128xf32, #tpu.memory_space<vmem>>, vector<2x128xf32>
    %cst_6 = arith.constant dense<0.000000e+00> : vector<2x128xf32>
    %10 = tpu.matmul %4, %8, %cst_6 {dimension_numbers = #tpu.dot_dimension_numbers<[1], [0], [0], [1], [0, 0, 1, 1], [], []>} : vector<2x512xf32>, vector<512x128xf32>, vector<2x128xf32> -> vector<2x128xf32>
    %11 = arith.addf %9, %10 : vector<2x128xf32>
    %c0_7 = arith.constant 0 : index
    %c0_8 = arith.constant 0 : index
    %12 = vector.load %arg6[%c0_7, %c0_8] : memref<2x128xf32, #tpu.memory_space<vmem>>, vector<2x128xf32>
    tpu.vector_store %arg6[%c0_7, %c0_8], %11 {strides = array<i32>} : memref<2x128xf32, #tpu.memory_space<vmem>>, vector<2x128xf32>,
    %c3_i32 = arith.constant 3 : i32
    %13 = arith.cmpi eq, %arg1, %c3_i32 : i32
    %14 = arith.extui %13 : i1 to i32
    %c0_i32_9 = arith.constant 0 : i32
    %15 = arith.cmpi ne, %14, %c0_i32_9 : i32
    scf.if %15 {
      %c0_10 = arith.constant 0 : index
      %c0_11 = arith.constant 0 : index
      %16 = vector.load %arg6[%c0_10, %c0_11] : memref<2x128xf32, #tpu.memory_space<vmem>>, vector<2x128xf32>
      %c0_12 = arith.constant 0 : index
      %c0_13 = arith.constant 0 : index
      %17 = vector.load %arg4[%c0_12, %c0_13] : memref<1x128xf32, #tpu.memory_space<vmem>>, vector<1x128xf32>
      %18 = vector.broadcast %17 : vector<1x128xf32> to vector<2x128xf32>
      %19 = arith.addf %16, %18 : vector<2x128xf32>
      %c0_14 = arith.constant 0 : index
      %c0_15 = arith.constant 0 : index
      %20 = vector.load %arg5[%c0_14, %c0_15] : memref<2x128xf32, #tpu.memory_space<vmem>>, vector<2x128xf32>
      tpu.vector_store %arg5[%c0_14, %c0_15], %19 {strides = array<i32>} : memref<2x128xf32, #tpu.memory_space<vmem>>, vector<2x128xf32>,
    } else {
    }
    return
  }
  func.func @transform_0(%arg0: i32, %arg1: i32) -> (i32, i32, i32) {
    %c0_i32 = arith.constant 0 : i32
    %c0_i32_0 = arith.constant 0 : i32
    return %arg0, %c0_i32, %arg1 : i32, i32, i32
  }
  func.func @transform_1(%arg0: i32, %arg1: i32) -> (i32, i32) {
    %c0_i32 = arith.constant 0 : i32
    %c0_i32_0 = arith.constant 0 : i32
    %c0_i32_1 = arith.constant 0 : i32
    return %c0_i32, %c0_i32_0 : i32, i32
  }
  func.func @transform_2(%arg0: i32, %arg1: i32) -> (i32, i32) {
    %c0_i32 = arith.constant 0 : i32
    %c0_i32_0 = arith.constant 0 : i32
    %c0_i32_1 = arith.constant 0 : i32
    return %c0_i32, %c0_i32_0 : i32, i32
  }
  func.func @transform_3(%arg0: i32, %arg1: i32) -> (i32, i32) {
    %c0_i32 = arith.constant 0 : i32
    %c0_i32_0 = arith.constant 0 : i32
    return %arg0, %c0_i32 : i32, i32
  }
}

</mosaic_0001>

<bundles_post_ra>
// kernel: tpu_custom_call.1
= control target key start
LH: loop header
LB: loop body
LE: loop exit
PB: predicated region body
PF: predicated region fallthrough
CT: control target
= control target key end

     0   :  { %8 = vsyncpa [#allocation4], 0  ;;  %s1044_s0 = inlined_call_operand.hbm [shape: f32[2,16,2048], index: 0, kind: input, shape index: {}]   ;;  %s1045_s1 = inlined_call_operand.hbm [shape: f32[2048,128], index: 1, kind: input, shape index: {}]   ;;  %s1046_s2 = inlined_call_operand.vmem [shape: f32[1,128], index: 2, kind: input, shape index: {}]   ;;  %s1047_s3 = inlined_call_operand.hbm [shape: f32[2,128], index: 3, kind: output, shape index: {}]  }
   0x1   :  { %10 = vsyncpa [#allocation4 + $0x1], 0 }
   0x2   :  { %11 = vsyncpa [#allocation7], 0 }
   0x3   :  { %12 = vsyncpa [#allocation5], 0  ;;  %s835_s12 = smov 0   ;;  %s837_s13 = smov 0  }
   0x4   :  { %s839_s14 = smov 0   ;;  %s841_s15 = smov 0  }
   0x5   :  { %s843_s16 = smov 0   ;;  %s845_s17 = smov 0  }
   0x6 LB: > { %s561_s18 = sadd.s32 4294967295, %s805_s17   ;;  %p52_p0 = scmp.ne.s32.totalorder %s789_s13, %s785_s12  ;;  %s805_s17 = sphi %s845_s17, %s18_s17   ;;  %s801_s16 = sphi %s843_s16, %s1056_s16   ;;  %s797_s15 = sphi %s841_s15, %s1055_s15   ;;  %s793_s14 = sphi %s839_s14, %s1054_s14   ;;  %s789_s13 = sphi %s837_s13, %s1053_s13   ;;  %s785_s12 = sphi %s835_s12, %s1052_s12  }
   0x7   : > { %p867_p1 = scmp.eq.s32.totalorder %s561_s18, 0  ;;  %p562_p2 = scmp.ge.s32.totalorder %s805_s17, 1 }
   0x8   : > { %p131_p3 = scmp.lt.s32.totalorder %s805_s17, 5  ;;  %s142_s23 = sshll.u32 %s1045_s1, 4  ;;  %s143_s23 = int_to_ptr.hbm [resolvable:$true] %s142_s23 }
   0x9   : > { %p875_p4 = por %p867_p1, %p52_p0  ;;  %s807_s25 = smov [#allocation6]  }
   0xa   : > { %p882_p5 = pnand %p562_p2, %p131_p3  ;;  %s144_s26 = sshll.u32 %s807_s25, 4  ;;  %s145_s26 = int_to_ptr.vmem [resolvable:$true] %s144_s26 }
   0xb   : > { %s808_s27 = smov 128   ;;  %s809_s28 = smov 8  }
   0xc   : > { %p589_p6 = pneg %p882_p5  ;;  %s27_s29 = sadd.s32 1, %s801_s16 }
   0xd   : > { %p28_p8 = scmp.ge.s32.totalorder %s27_s29, 4  ;;  %s39_s30 = sadd.s32 1, %s793_s14 }
   0xe   : > { %p590_p7 = pnand %p589_p6, %p867_p1  ;;  %p46_p9 = scmp.ne.s32.totalorder %s793_s14, %s789_s13 }
   0xf   : > { %p47_p10 = scmp.eq.s32.totalorder %s805_s17, 0  ;;  %s1058_s29 = smov (%p28_p8, %s27_s29), 0 }
  0x10   : > { %592 = dma.hbm_to_vmem [thread:$0]  (!%p590_p7), %s143_s23, 32768, %s145_s26, [#allocation7], %s808_s27, %s808_s27, %s809_s28  }
  0x11   : > { %p897_p11 = por %p47_p10, %p46_p9  ;;  %p598_p12 = scmp.lt.s32.totalorder %s805_s17, 4 }
  0x12   : > { %s35_s5 = ssub.s32 %s801_s16, %s1058_s29  ;;  %s161_s6 = sand.u32 1, %s793_s14  }
  0x13   : > { %p37_p13 = scmp.eq.s32.totalorder %s35_s5, 0  ;;  %s565_s7 = sshll.u32 %s161_s6, 7 }
  0x14   : > { %s578_s8 = sshll.u32 %s801_s16, 5  ;;  %s165_s22 = scalar_lea.vmem [#allocation3], %s565_s7 }
  0x15   : > { %s907_s9 = scalar_select %p37_p13, %s793_s14, %s39_s30  }
  0x16   : > { %s173_s12 = scalar_lea.hbm %s1044_s0, %s578_s8  ;;  %s176_s23 = sshll.u32 %s165_s22, 4  ;;  %s177_s23 = int_to_ptr.vmem [resolvable:$true] %s176_s23 }
  0x17   : > { %s174_s21 = sshll.u32 %s173_s12, 4  ;;  %p594_p0 = pnand %p598_p12, %p897_p11  ;;  %s175_s21 = int_to_ptr.hbm [resolvable:$true] %s174_s21 }
  0x18   : > { %s162_s25 = scalar_lea.sflag [#allocation4], %s161_s6  ;;  %s810_s26 = smov 2048  }
  0x19   : > { %s811_s27 = smov 512   ;;  %s812_s28 = smov 32  }
  0x1a   : > { %596 = dma.hbm_to_vmem [thread:$0]  (!%p594_p0), %s175_s21, 2048, %s177_s23, %s162_s25, %s810_s26, %s811_s27, %s812_s28  }
  0x1b   : > { %188 = sbr.rel (%p882_p5) target bundleno = 236 (0xec), region = 32  ;;  %s190_s30 = sand.u32 (!%p882_p5), 1, %s789_s13  }
  0x1c   : > { %s569_s5 = sshll.u32 (!%p882_p5), %s190_s30, 7  ;;  %s191_s8 = scalar_lea.sflag (!%p882_p5), [#allocation4], %s190_s30 }
  0x1d   : > { %s919_s7 = scalar_lea.vmem (!%p882_p5), [#allocation3], %s569_s5 }
  0x20   : > { %772 = dma.done.wait (%p875_p4), %s191_s8, 2048  }
  0x21   : > { %774 = vsyncadd (%p875_p4), %s191_s8, 4294965248 }
  0x22   : > { %776 = dma.done.wait (%p867_p1), [#allocation7], 32768  }
  0x23   : > { %778 = vsyncadd (%p867_p1), [#allocation7], 4294934528  ;;  %p571_p2 = scmp.ne.s32.totalorder %s797_s15, 0 }
  0x25   : > { %223 = sbr.rel (%p571_p2) target bundleno = 44 (0x2c), region = 44 }
  0x2a   : > { %v813_v0 = vmov 0.0  }
  0x2b   : > { %224 = vst [vmem:[#allocation2] sm:$0x3] %v813_v0 }
  0x2c PF: > { %s572_s24 = sshll.u32 %s797_s15, 9  ;;  %v227_v1 = vld [vmem:[%s919_s7 + $0x10] sm:$0xff]  ;;  %v228_v18 = vld [vmem:[%s919_s7 + $0x18] sm:$0xff]  ;;  %vm372_vm0 = vcmask 1041409   ;;  %p573_p1 = scmp.ne.s32.totalorder %s797_s15, 3 }
  0x2d   : > { %v231_v2 = vld [vmem:[%s919_s7 + $0x30] sm:$0xff]  ;;  %s935_s20 = scalar_lea.vmem [#allocation6], %s572_s24  ;;  %v232_v26 = vld [vmem:[%s919_s7 + $0x38] sm:$0xff] }
  0x2e   : > { %v235_v3 = vld [vmem:[%s919_s7 + $0x50] sm:$0xff]  ;;  %v344_v10 = vld [vmem:[%s935_s20 + $0x168] sm:$0xff]  ;;  %v255_v11 = vadd.f32 %v231_v2, %v227_v1  ;;  %v343_v19 = vld [vmem:[%s935_s20 + $0x160] sm:$0xff]  ;;  %v262_v33 = vadd.f32 %v232_v26, %v228_v18 }
  0x2f   : > { %v239_v4 = vld [vmem:[%s919_s7 + $0x70] sm:$0xff]  ;;  %v360_v16 = vld [vmem:[%s935_s20 + $0x1e8] sm:$0xff]  ;;  %v359_v21 = vld [vmem:[%s935_s20 + $0x1e0] sm:$0xff] }
  0x30   : > { %v346_v5 = vld [vmem:[%s935_s20 + $0x178] sm:$0xff]  ;;  %v345_v6 = vld [vmem:[%s935_s20 + $0x170] sm:$0xff]  ;;  %v283_v12 = vadd.f32 %v239_v4, %v235_v3  ;;  %v312_v17 = vld [vmem:[%s935_s20 + $0x68] sm:$0xff]  ;;  %v256_v24 = vrot.slane %v255_v11, 4  ;;  %v263_v44 = vrot.slane %v262_v33, 4 }
  0x31   : > { %v362_v7 = vld [vmem:[%s935_s20 + $0x1f8] sm:$0xff]  ;;  %421 = vmatpush.msra.mxu2 %v346_v5  ;;  %v361_v13 = vld [vmem:[%s935_s20 + $0x1f0] sm:$0xff]  ;;  %v328_v20 = vld [vmem:[%s935_s20 + $0xe8] sm:$0xff] }
  0x32   : > { %441 = vmatpush.msra.mxu3 %v362_v7  ;;  %v314_v8 = vld [vmem:[%s935_s20 + $0x78] sm:$0xff]  ;;  %v313_v14 = vld [vmem:[%s935_s20 + $0x70] sm:$0xff]  ;;  %v311_v22 = vld [vmem:[%s935_s20 + $0x60] sm:$0xff]  ;;  %v284_v25 = vrot.slane %v283_v12, 4  ;;  %v257_v36 = vadd.f32 %v256_v24, %v255_v11  ;;  %v264_v55 = vadd.f32 %v263_v44, %v262_v33 }
  0x33   : > { %v330_v9 = vld [vmem:[%s935_s20 + $0xf8] sm:$0xff]  ;;  %381 = vmatpush.msra.mxu0 %v314_v8  ;;  %v329_v15 = vld [vmem:[%s935_s20 + $0xf0] sm:$0xff]  ;;  %422 = vmatpush.msra.mxu2 %v345_v6  ;;  %v327_v23 = vld [vmem:[%s935_s20 + $0xe0] sm:$0xff] }
  0x34   : > { %401 = vmatpush.msra.mxu1 %v330_v9  ;;  %442 = vmatpush.msra.mxu3 %v361_v13  ;;  %v342_v27 = vld [vmem:[%s935_s20 + $0x158] sm:$0xff]  ;;  %v341_v31 = vld [vmem:[%s935_s20 + $0x150] sm:$0xff]  ;;  %v285_v37 = vadd.f32 %v284_v25, %v283_v12  ;;  %v340_v38 = vld [vmem:[%s935_s20 + $0x148] sm:$0xff]  ;;  %v258_v47 = vrot.slane %v257_v36, 2  ;;  %v265_v7 = vrot.slane %v264_v55, 2 }
  0x35   : > { %382 = vmatpush.msra.mxu0 %v313_v14  ;;  %423 = vmatpush.msra.mxu2 %v344_v10  ;;  %v358_v28 = vld [vmem:[%s935_s20 + $0x1d8] sm:$0xff]  ;;  %v357_v32 = vld [vmem:[%s935_s20 + $0x1d0] sm:$0xff]  ;;  %v356_v39 = vld [vmem:[%s935_s20 + $0x1c8] sm:$0xff] }
  0x36   : > { %402 = vmatpush.msra.mxu1 %v329_v15  ;;  %443 = vmatpush.msra.mxu3 %v360_v16  ;;  %v310_v29 = vld [vmem:[%s935_s20 + $0x58] sm:$0xff]  ;;  %v309_v34 = vld [vmem:[%s935_s20 + $0x50] sm:$0xff]  ;;  %v308_v40 = vld [vmem:[%s935_s20 + $0x48] sm:$0xff]  ;;  %v286_v48 = vrot.slane %v285_v37, 2  ;;  %v259_v59 = vadd.f32 %v258_v47, %v257_v36 }
  0x37   : > { %383 = vmatpush.msra.mxu0 %v312_v17  ;;  %424 = vmatpush.msra.mxu2 %v343_v19  ;;  %v326_v30 = vld [vmem:[%s935_s20 + $0xd8] sm:$0xff]  ;;  %v325_v35 = vld [vmem:[%s935_s20 + $0xd0] sm:$0xff]  ;;  %v324_v41 = vld [vmem:[%s935_s20 + $0xc8] sm:$0xff] }
  0x38   : > { %403 = vmatpush.msra.mxu1 %v328_v20  ;;  %444 = vmatpush.msra.mxu3 %v359_v21  ;;  %v339_v42 = vld [vmem:[%s935_s20 + $0x140] sm:$0xff]  ;;  %v338_v49 = vld [vmem:[%s935_s20 + $0x138] sm:$0xff]  ;;  %v337_v53 = vld [vmem:[%s935_s20 + $0x130] sm:$0xff]  ;;  %v287_v60 = vadd.f32 %v286_v48, %v285_v37  ;;  %v260_v10 = vrot.slane %v259_v59, 1 }
  0x39   : > { %384 = vmatpush.msra.mxu0 %v311_v22  ;;  %425 = vmatpush.msra.mxu2 %v342_v27  ;;  %v355_v43 = vld [vmem:[%s935_s20 + $0x1c0] sm:$0xff]  ;;  %v354_v50 = vld [vmem:[%s935_s20 + $0x1b8] sm:$0xff]  ;;  %v353_v54 = vld [vmem:[%s935_s20 + $0x1b0] sm:$0xff] }
  0x3a   : > { %404 = vmatpush.msra.mxu1 %v327_v23  ;;  %445 = vmatpush.msra.mxu3 %v358_v28  ;;  %v307_v45 = vld [vmem:[%s935_s20 + $0x40] sm:$0xff]  ;;  %v306_v51 = vld [vmem:[%s935_s20 + $0x38] sm:$0xff]  ;;  %v336_v56 = vld [vmem:[%s935_s20 + $0x128] sm:$0xff]  ;;  %v288_v11 = vrot.slane %v287_v60, 1  ;;  %v266_v23 = vadd.f32 %v265_v7, %v264_v55 }
  0x3b   : > { %385 = vmatpush.msra.mxu0 %v310_v29  ;;  %426 = vmatpush.msra.mxu2 %v341_v31  ;;  %v323_v46 = vld [vmem:[%s935_s20 + $0xc0] sm:$0xff]  ;;  %v322_v52 = vld [vmem:[%s935_s20 + $0xb8] sm:$0xff]  ;;  %v305_v57 = vld [vmem:[%s935_s20 + $0x30] sm:$0xff]  ;;  %v261_v31 = vadd.f32 %v260_v10, %v259_v59 }
  0x3c   : > { %405 = vmatpush.msra.mxu1 %v326_v30  ;;  %446 = vmatpush.msra.mxu3 %v357_v32  ;;  %v321_v58 = vld [vmem:[%s935_s20 + $0xb0] sm:$0xff]  ;;  %v335_v61 = vld [vmem:[%s935_s20 + $0x120] sm:$0xff]  ;;  %v352_v62 = vld [vmem:[%s935_s20 + $0x1a8] sm:$0xff]  ;;  %v289_v32 = vadd.f32 %v288_v11, %v287_v60 }
  0x3d   : > { %386 = vmatpush.msra.mxu0 %v309_v34  ;;  %427 = vmatpush.msra.mxu2 %v340_v38  ;;  %v304_v63 = vld [vmem:[%s935_s20 + $0x28] sm:$0xff]  ;;  %v351_v1 = vld [vmem:[%s935_s20 + $0x1a0] sm:$0xff]  ;;  %v334_v3 = vld [vmem:[%s935_s20 + $0x118] sm:$0xff] }
  0x3e   : > { %406 = vmatpush.msra.mxu1 %v325_v35  ;;  %447 = vmatpush.msra.mxu3 %v356_v39  ;;  %v320_v0 = vld [vmem:[%s935_s20 + $0xa8] sm:$0xff]  ;;  %v303_v2 = vld [vmem:[%s935_s20 + $0x20] sm:$0xff]  ;;  %v350_v5 = vld [vmem:[%s935_s20 + $0x198] sm:$0xff] }
  0x3f   : > { %387 = vmatpush.msra.mxu0 %v308_v40  ;;  %428 = vmatpush.msra.mxu2 %v339_v42  ;;  %v319_v4 = vld [vmem:[%s935_s20 + $0xa0] sm:$0xff]  ;;  %v302_v8 = vld [vmem:[%s935_s20 + $0x18] sm:$0xff]  ;;  %v333_v13 = vld [vmem:[%s935_s20 + $0x110] sm:$0xff] }
  0x40   : > { %407 = vmatpush.msra.mxu1 %v324_v41  ;;  %448 = vmatpush.msra.mxu3 %v355_v43  ;;  %v236_v6 = vld [vmem:[%s919_s7 + $0x58] sm:$0xff]  ;;  %v225_v15 = vld [vmem:[%s919_s7] sm:$0xff]  ;;  %v226_v20 = vld [vmem:[%s919_s7 + $0x8] sm:$0xff] }
  0x41   : > { %388 = vmatpush.msra.mxu0 %v307_v45  ;;  %429 = vmatpush.msra.mxu2 %v338_v49  ;;  %v318_v9 = vld [vmem:[%s935_s20 + $0x98] sm:$0xff]  ;;  %v229_v16 = vld [vmem:[%s919_s7 + $0x20] sm:$0xff]  ;;  %v230_v21 = vld [vmem:[%s919_s7 + $0x28] sm:$0xff] }
  0x42   : > { %408 = vmatpush.msra.mxu1 %v323_v46  ;;  %449 = vmatpush.msra.mxu3 %v354_v50  ;;  %v240_v12 = vld [vmem:[%s919_s7 + $0x78] sm:$0xff]  ;;  %v233_v17 = vld [vmem:[%s919_s7 + $0x40] sm:$0xff]  ;;  %v241_v19 = vadd.f32 %v229_v16, %v225_v15  ;;  %v349_v22 = vld [vmem:[%s935_s20 + $0x190] sm:$0xff]  ;;  %v248_v28 = vadd.f32 %v230_v21, %v226_v20  ;;  %v267_v46 = vrot.slane %v266_v23, 1  ;;  %v375_v50 = vsel %vm372_vm0, %v289_v32, %v261_v31 }
  0x43   : > { %389 = vmatpush.msra.mxu0 %v306_v51  ;;  %430 = vmatpush.msra.mxu2 %v337_v53  ;;  %v290_v14 = vadd.f32 %v240_v12, %v236_v6  ;;  %v237_v18 = vld [vmem:[%s919_s7 + $0x60] sm:$0xff]  ;;  %v234_v26 = vld [vmem:[%s919_s7 + $0x48] sm:$0xff] }
  0x44   : > { %409 = vmatpush.msra.mxu1 %v322_v52  ;;  %450 = vmatpush.msra.mxu3 %v353_v54  ;;  %v269_v25 = vadd.f32 %v237_v18, %v233_v17  ;;  %v238_v27 = vld [vmem:[%s919_s7 + $0x68] sm:$0xff]  ;;  %v242_v33 = vrot.slane %v241_v19, 4  ;;  %v249_v39 = vrot.slane %v248_v28, 4  ;;  %v331_v44 = vld [vmem:[%s935_s20 + $0x100] sm:$0xff]  ;;  %v268_v60 = vadd.f32 %v267_v46, %v266_v23 }
  0x45   : > { %390 = vmatpush.msra.mxu0 %v305_v57  ;;  %431 = vmatpush.msra.mxu2 %v336_v56  ;;  %v291_v24 = vrot.slane %v290_v14, 4  ;;  %v301_v29 = vld [vmem:[%s935_s20 + $0x10] sm:$0xff]  ;;  %v276_v34 = vadd.f32 %v238_v27, %v234_v26  ;;  %v332_v35 = vld [vmem:[%s935_s20 + $0x108] sm:$0xff]  ;;  %v347_v45 = vld [vmem:[%s935_s20 + $0x180] sm:$0xff] }
  0x46   : > { %410 = vmatpush.msra.mxu1 %v321_v58  ;;  %451 = vmatpush.msra.mxu3 %v352_v62  ;;  %v317_v30 = vld [vmem:[%s935_s20 + $0x90] sm:$0xff]  ;;  %v348_v36 = vld [vmem:[%s935_s20 + $0x188] sm:$0xff]  ;;  %v270_v38 = vrot.slane %v269_v25, 4  ;;  %v243_v42 = vadd.f32 %v242_v33, %v241_v19  ;;  %v250_v49 = vadd.f32 %v249_v39, %v248_v28  ;;  %v299_v51 = vld [vmem:[%s935_s20] sm:$0xff] }
  0x47   : > { %391 = vmatpush.msra.mxu0 %v304_v63  ;;  %432 = vmatpush.msra.mxu2 %v335_v61  ;;  %v292_v37 = vadd.f32 %v291_v24, %v290_v14  ;;  %v300_v40 = vld [vmem:[%s935_s20 + $0x8] sm:$0xff]  ;;  %v277_v43 = vrot.slane %v276_v34, 4  ;;  %v315_v55 = vld [vmem:[%s935_s20 + $0x80] sm:$0xff] }
  0x48   : > { %411 = vmatpush.msra.mxu1 %v320_v0  ;;  %452 = vmatpush.msra.mxu3 %v351_v1  ;;  %v316_v41 = vld [vmem:[%s935_s20 + $0x88] sm:$0xff]  ;;  %v271_v48 = vadd.f32 %v270_v38, %v269_v25  ;;  %v244_v52 = vrot.slane %v243_v42, 2  ;;  %v251_v57 = vrot.slane %v250_v49, 2  ;;  %v363_v19 = vld [vmem:[#allocation2] sm:$0x3] }
  0x49   : > { %392 = vmatpush.msra.mxu0 %v303_v2  ;;  %433 = vmatpush.msra.mxu2 %v334_v3  ;;  %v293_v47 = vrot.slane %v292_v37, 2  ;;  %v278_v53 = vadd.f32 %v277_v43, %v276_v34 }
  0x4a   : > { %412 = vmatpush.msra.mxu1 %v319_v4  ;;  %453 = vmatpush.msra.mxu3 %v350_v5  ;;  %v272_v56 = vrot.slane %v271_v48, 2  ;;  %v245_v58 = vadd.f32 %v244_v52, %v243_v42  ;;  %v252_v63 = vadd.f32 %v251_v57, %v250_v49 }
  0x4b   : > { %393 = vmatpush.msra.mxu0 %v302_v8  ;;  %434 = vmatpush.msra.mxu2 %v333_v13  ;;  %v294_v54 = vadd.f32 %v293_v47, %v292_v37  ;;  %v279_v59 = vrot.slane %v278_v53, 2 }
  0x4c   : > { %413 = vmatpush.msra.mxu1 %v318_v9  ;;  %454 = vmatpush.msra.mxu3 %v349_v22  ;;  %v273_v62 = vadd.f32 %v272_v56, %v271_v48  ;;  %v246_v0 = vrot.slane %v245_v58, 1  ;;  %v253_v4 = vrot.slane %v252_v63, 1 }
  0x4d   : > { %394 = vmatpush.msra.mxu0 %v301_v29  ;;  %435 = vmatpush.msra.mxu2 %v332_v35  ;;  %v295_v61 = vrot.slane %v294_v54, 1  ;;  %v280_v1 = vadd.f32 %v279_v59, %v278_v53 }
  0x4e   : > { %414 = vmatpush.msra.mxu1 %v317_v30  ;;  %455 = vmatpush.msra.mxu3 %v348_v36  ;;  %v274_v3 = vrot.slane %v273_v62, 1  ;;  %v247_v5 = vadd.f32 %v246_v0, %v245_v58  ;;  %v254_v9 = vadd.f32 %v253_v4, %v252_v63 }
  0x4f   : > { %395 = vmatpush.msra.mxu0 %v300_v40  ;;  %436 = vmatpush.msra.mxu2 %v331_v44  ;;  %v296_v2 = vadd.f32 %v295_v61, %v294_v54  ;;  %v281_v6 = vrot.slane %v280_v1, 1 }
  0x50   : > { %415 = vmatpush.msra.mxu1 %v316_v41  ;;  %456 = vmatpush.msra.mxu3 %v347_v45  ;;  %v275_v8 = vadd.f32 %v274_v3, %v273_v62 }
  0x51   : > { %437 = vmatmul.f32.vlgmr.msra.gmra.mxu2 %v375_v50  ;;  %396 = vmatpush.msra.mxu0 %v299_v51  ;;  %v376_v7 = vsel %vm372_vm0, %v296_v2, %v268_v60  ;;  %v282_v10 = vadd.f32 %v281_v6, %v280_v1 }
  0x52   : > { %416 = vmatpush.msra.mxu1 %v315_v55  ;;  %457 = vmatmul.f32.vlgmr.msra.gmra.mxu3 %v376_v7  ;;  %v373_v11 = vsel %vm372_vm0, %v275_v8, %v247_v5 }
  0x53   : > { %397 = vmatmul.f32.vlgmr.msra.gmra.mxu0 %v373_v11  ;;  %v374_v12 = vsel %vm372_vm0, %v282_v10, %v254_v9 }
  0x54   : > { %417 = vmatmul.f32.vlgmr.msra.gmra.mxu1 %v374_v12 }
  0xd0   : > { %v398_v13 = vpop.f32.mrf.mxu0 }
  0xd1   : > { %v418_v14 = vpop.f32.mrf.mxu1 }
  0xd2   : > { %v419_v16 = vadd.f32 %v418_v14, %v398_v13 }
  0xd4   : > { %v438_v15 = vpop.f32.mrf.mxu2 }
  0xd5   : > { %v439_v17 = vadd.f32 %v438_v15, %v419_v16  ;;  %v458_v18 = vpop.f32.mrf.mxu3 }
  0xd7   : > { %v459_v20 = vadd.f32 %v458_v18, %v439_v17  ;;  %466 = sbr.rel (%p573_p1) target bundleno = 230 (0xe6), region = 48 }
  0xd9   : > { %v461_v21 = vadd.f32 %v459_v20, %v363_v19 }
  0xdb   : > { %462 = vst [vmem:[#allocation2] sm:$0x3] %v461_v21 }
  0xdc   : > { %v658_v23 = vld [vmem:[%s1046_s2] ss:$0 sm:$0xff] }
  0xe2   : > { %v467_v22 = vld [vmem:[#allocation2] sm:$0x3] }
  0xe3   : > { %v472_v24 = vadd.f32 %v658_v23, %v467_v22 }
  0xe5   : > { %473 = vst [vmem:[#allocation8] sm:$0x3] %v472_v24 }
  0xe6 PF: > { %p600_p3 = scmp.eq.s32.totalorder %s561_s18, 3  ;;  %s484_s11 = sshll.u32 %s1047_s3, 4  ;;  %s485_s11 = int_to_ptr.hbm [resolvable:$true] %s484_s11 }
  0xe7   : > { %s814_s12 = smov [#allocation8]  }
  0xe8   : > { %s482_s21 = sshll.u32 %s814_s12, 4  ;;  %s483_s21 = int_to_ptr.vmem [resolvable:$true] %s482_s21 }
  0xe9   : > { %586 = dma.vmem_to_hbm [thread:$0]  (%p600_p3), %s483_s21, 32, %s485_s11, [#allocation5]  }
  0xea   : > { %780 = dma.done.wait (%p600_p3), [#allocation5], 32  }
  0xeb   : > { %782 = vsyncadd (%p600_p3), [#allocation5], 4294967264 }
  0xec PF: > { %s18_s17 = sadd.s32 1, %s805_s17   ;;  %s1052_s12 = smov %s789_s13 }
  0xed   : > { %p15_p4 = scmp.ge.s32.totalorder %s18_s17, 6   ;;  %s1053_s13 = smov %s793_s14 }
  0xee   : > { %s1054_s14 = smov %s907_s9  ;;  %s1055_s15 = smov %s801_s16 }
  0xef   : > { %s1056_s16 = smov %s1058_s29  ;;  %17 = sbr.rel (!%p15_p4) target bundleno = 6 (0x6), region = 83 }
  0xf4   :  { %498 = vsyncpa [#allocation4], 1 }
  0xf5   :  { %500 = vsyncpa [#allocation4 + $0x1], 1 }
  0xf6   :  { %501 = vsyncpa [#allocation7], 1 }
  0xf7   :  { %502 = vsyncpa [#allocation5], 1 }
  0xf8   :  { %504 = vsyncpa [#allocation5 + $0x1], 1 }

</bundles_post_ra>
